<compile_context>
chip_gen: v6e
topology: v6e:2x2x1
jax: 0.10.0
libtpu: 0.0.40
codegen_flags: <defaults>
</compile_context>

<pallas_src>
import functools

import jax
import jax.numpy as jnp
from jax.experimental import pallas as pl
from jax.experimental.pallas import tpu as pltpu


NEG_BIG = -1e30  # effectively -inf for f32 softmax masking


def _round_up(x: int, m: int) -> int:
    return ((x + m - 1) // m) * m


def mlp_kernel(x_ref, w1_ref, b1_ref, w2_ref, b2_ref, o_ref, *, num_valid):
    # fc1: Linear(K -> 256) + ReLU  (bf16 inputs, f32 accumulate)
    h = jnp.dot(x_ref[...], w1_ref[...], preferred_element_type=jnp.float32)
    h = jnp.maximum(h + b1_ref[...], 0.0)

    # fc2: Linear(256 -> Np) + ReLU
    z = jnp.dot(h.astype(w2_ref.dtype), w2_ref[...],
                preferred_element_type=jnp.float32)
    z = jnp.maximum(z + b2_ref[...], 0.0)

    # Mask the padded logit columns so they contribute exp(-inf)=0 to softmax.
    col = jax.lax.broadcasted_iota(jnp.int32, z.shape, 1)
    z = jnp.where(col < num_valid, z, NEG_BIG)

    # Numerically stable softmax over dim=1.
    m = jnp.max(z, axis=1, keepdims=True)
    e = jnp.exp(z - m)
    denom = jnp.sum(e, axis=1, keepdims=True)
    o_ref[...] = (e * pl.reciprocal(denom, approx=True)).astype(o_ref.dtype)


def simple_classifier_forward(x, w1, b1, w2, b2, *, tb=512, use_bf16=True):
    """x: (B, 200), w1: (200, 256), b1: (256,)|(1,256), w2: (256, 10), b2: (10,)|(1,10)."""
    B, K = x.shape
    hid = w1.shape[1]
    out_dim = w2.shape[1]

    K_pad = _round_up(K, 256)      # 200 -> 256: MXU-aligned contraction
    N_pad = _round_up(out_dim, 128)  # 10 -> 128: lane-dense output slab

    TB = min(tb, _round_up(B, 8))  # batch tile, multiple of 8 sublanes
    Bp = _round_up(B, TB)

    cdt = jnp.bfloat16 if use_bf16 else jnp.float32

    # Pad / cast once in the wrapper.
    xp = jnp.zeros((Bp, K_pad), cdt).at[:B, :K].set(x.astype(cdt))
    w1p = jnp.zeros((K_pad, hid), cdt).at[:K, :].set(w1.astype(cdt))
    b1p = jnp.asarray(b1, jnp.float32).reshape(1, hid)
    w2p = jnp.zeros((hid, N_pad), cdt).at[:, :out_dim].set(w2.astype(cdt))
    b2p = jnp.zeros((1, N_pad), jnp.float32).at[:, :out_dim].set(
        jnp.asarray(b2, jnp.float32).reshape(1, out_dim))

    grid = (Bp // TB,)

    out = pl.pallas_call(
        functools.partial(mlp_kernel, num_valid=out_dim),
        out_shape=jax.ShapeDtypeStruct((Bp, N_pad), jnp.float32),
        grid_spec=pltpu.PrefetchScalarGridSpec(
            num_scalar_prefetch=0,
            grid=grid,
            in_specs=[
                pl.BlockSpec((TB, K_pad), lambda i: (i, 0)),   # x tile
                pl.BlockSpec((K_pad, hid), lambda i: (0, 0)),  # w1 (resident)
                pl.BlockSpec((1, hid), lambda i: (0, 0)),      # b1 (resident)
                pl.BlockSpec((hid, N_pad), lambda i: (0, 0)),  # w2 (resident)
                pl.BlockSpec((1, N_pad), lambda i: (0, 0)),    # b2 (resident)
            ],
            out_specs=pl.BlockSpec((TB, N_pad), lambda i: (i, 0)),
        ),
        compiler_params=pltpu.CompilerParams(
            dimension_semantics=("parallel",),  # megacore split of batch tiles on v7x
        ),
    )(xp, w1p, b1p, w2p, b2p)

    return out[:B, :out_dim]


def init_params(key):
    """Deterministic PyTorch-style uniform(-1/sqrt(fan_in), 1/sqrt(fan_in)) init."""
    k1, k2, k3, k4 = jax.random.split(key, 4)
    in1, hid, out = 200, 256, 10
    bound1 = 1.0 / jnp.sqrt(jnp.float32(in1))
    bound2 = 1.0 / jnp.sqrt(jnp.float32(hid))
    w1 = jax.random.uniform(k1, (in1, hid), jnp.float32, -bound1, bound1)
    b1 = jax.random.uniform(k2, (1, hid), jnp.float32, -bound1, bound1)
    w2 = jax.random.uniform(k3, (hid, out), jnp.float32, -bound2, bound2)
    b2 = jax.random.uniform(k4, (1, out), jnp.float32, -bound2, bound2)
    return w1, b1, w2, b2


def reference_forward(x, w1, b1, w2, b2):
    h = jnp.maximum(x @ w1 + b1, 0.0)
    z = jnp.maximum(h @ w2 + b2, 0.0)
    return jax.nn.softmax(z, axis=1)


if __name__ == "__main__":
    key = jax.random.PRNGKey(0)
    kx, kp = jax.random.split(key)

    B = 8
    x = jax.random.normal(kx, (B, 200), jnp.float32)
    w1, b1, w2, b2 = init_params(kp)

    out = simple_classifier_forward(x, w1, b1, w2, b2)
    out = jax.block_until_ready(out)

    ref = reference_forward(x, w1, b1, w2, b2)
    assert out.shape == (B, 10)
    # bf16 MXU inputs + approx reciprocal -> loosen tolerance vs f32 reference.
    assert jnp.allclose(out, ref, atol=1e-2, rtol=1e-2)
    # rows of a softmax sum to 1
    assert jnp.allclose(jnp.sum(out, axis=1), jnp.ones((B,)), atol=5e-3)

    print("KERNEL_OK")
</pallas_src>

<mosaic_0001>
module attributes {stable_mosaic.version = 11 : i64} {
  func.func @mlp_kernel(%arg0: i32, %arg1: memref<8x256xbf16, #tpu.memory_space<vmem>>, %arg2: memref<256x256xbf16, #tpu.memory_space<vmem>>, %arg3: memref<1x256xf32, #tpu.memory_space<vmem>>, %arg4: memref<256x128xbf16, #tpu.memory_space<vmem>>, %arg5: memref<1x128xf32, #tpu.memory_space<vmem>>, %arg6: memref<8x128xf32, #tpu.memory_space<vmem>>) attributes {dimension_semantics = [#tpu.dimension_semantics<parallel>], iteration_bounds = array<i64: 1>, scalar_prefetch = 0 : i64, scratch_operands = 0 : i64, tpu.core_type = #tpu.core_type<tc>, window_params = [{transform_indices = @transform_0, window_bounds = array<i64: 8, 256>}, {pipeline_mode = #tpu.pipeline_mode<synchronous>, transform_indices = @transform_1, window_bounds = array<i64: 256, 256>}, {pipeline_mode = #tpu.pipeline_mode<synchronous>, transform_indices = @transform_2, window_bounds = array<i64: 1, 256>}, {pipeline_mode = #tpu.pipeline_mode<synchronous>, transform_indices = @transform_3, window_bounds = array<i64: 256, 128>}, {pipeline_mode = #tpu.pipeline_mode<synchronous>, transform_indices = @transform_4, window_bounds = array<i64: 1, 128>}, {transform_indices = @transform_5, window_bounds = array<i64: 8, 128>}]} {
    %c0 = arith.constant 0 : index
    %c0_0 = arith.constant 0 : index
    %0 = vector.load %arg1[%c0, %c0_0] : memref<8x256xbf16, #tpu.memory_space<vmem>>, vector<8x256xbf16>
    %c0_1 = arith.constant 0 : index
    %c0_2 = arith.constant 0 : index
    %1 = vector.load %arg2[%c0_1, %c0_2] : memref<256x256xbf16, #tpu.memory_space<vmem>>, vector<256x256xbf16>
    %cst = arith.constant dense<0.000000e+00> : vector<8x256xf32>
    %2 = tpu.matmul %0, %1, %cst {dimension_numbers = #tpu.dot_dimension_numbers<[1], [0], [0], [1], [0, 0, 1, 1], [], []>} : vector<8x256xbf16>, vector<256x256xbf16>, vector<8x256xf32> -> vector<8x256xf32>
    %c0_3 = arith.constant 0 : index
    %c0_4 = arith.constant 0 : index
    %3 = vector.load %arg3[%c0_3, %c0_4] : memref<1x256xf32, #tpu.memory_space<vmem>>, vector<1x256xf32>
    %4 = vector.broadcast %3 : vector<1x256xf32> to vector<8x256xf32>
    %5 = arith.addf %2, %4 : vector<8x256xf32>
    %cst_5 = arith.constant 0.000000e+00 : f32
    %6 = vector.broadcast %cst_5 : f32 to vector<8x256xf32>
    %7 = arith.maximumf %5, %6 : vector<8x256xf32>
    %8 = arith.truncf %7 : vector<8x256xf32> to vector<8x256xbf16>
    %c0_6 = arith.constant 0 : index
    %c0_7 = arith.constant 0 : index
    %9 = vector.load %arg4[%c0_6, %c0_7] : memref<256x128xbf16, #tpu.memory_space<vmem>>, vector<256x128xbf16>
    %cst_8 = arith.constant dense<0.000000e+00> : vector<8x128xf32>
    %10 = tpu.matmul %8, %9, %cst_8 {dimension_numbers = #tpu.dot_dimension_numbers<[1], [0], [0], [1], [0, 0, 1, 1], [], []>} : vector<8x256xbf16>, vector<256x128xbf16>, vector<8x128xf32> -> vector<8x128xf32>
    %c0_9 = arith.constant 0 : index
    %c0_10 = arith.constant 0 : index
    %11 = vector.load %arg5[%c0_9, %c0_10] : memref<1x128xf32, #tpu.memory_space<vmem>>, vector<1x128xf32>
    %12 = vector.broadcast %11 : vector<1x128xf32> to vector<8x128xf32>
    %13 = arith.addf %10, %12 : vector<8x128xf32>
    %cst_11 = arith.constant 0.000000e+00 : f32
    %14 = vector.broadcast %cst_11 : f32 to vector<8x128xf32>
    %15 = arith.maximumf %13, %14 : vector<8x128xf32>
    %16 = tpu.iota {dimensions = array<i32: 1>} : vector<8x128xi32>
    %c10_i32 = arith.constant 10 : i32
    %17 = vector.broadcast %c10_i32 : i32 to vector<8x128xi32>
    %18 = arith.cmpi slt, %16, %17 : vector<8x128xi32>
    %cst_12 = arith.constant -1.000000e+30 : f32
    %19 = vector.broadcast %cst_12 : f32 to vector<8x128xf32>
    %20 = arith.select %18, %15, %19 : vector<8x128xi1>, vector<8x128xf32>
    %cst_13 = arith.constant dense<0xFF800000> : vector<8xf32>
    %21 = vector.multi_reduction <maximumf>, %20, %cst_13 [1] : vector<8x128xf32> to vector<8xf32>
    %22 = vector.shape_cast %21 : vector<8xf32> to vector<8x1xf32>
    %23 = vector.broadcast %22 : vector<8x1xf32> to vector<8x128xf32>
    %24 = arith.subf %20, %23 : vector<8x128xf32>
    %25 = math.exp %24 : vector<8x128xf32>
    %cst_14 = arith.constant dense<0.000000e+00> : vector<8xf32>
    %26 = vector.multi_reduction <add>, %25, %cst_14 [1] : vector<8x128xf32> to vector<8xf32>
    %27 = vector.shape_cast %26 : vector<8xf32> to vector<8x1xf32>
    %28 = tpu.reciprocal %27 {approx = true} : vector<8x1xf32> -> vector<8x1xf32>
    %29 = vector.broadcast %28 : vector<8x1xf32> to vector<8x128xf32>
    %30 = arith.mulf %25, %29 : vector<8x128xf32>
    %c0_15 = arith.constant 0 : index
    %c0_16 = arith.constant 0 : index
    %31 = vector.load %arg6[%c0_15, %c0_16] : memref<8x128xf32, #tpu.memory_space<vmem>>, vector<8x128xf32>
    tpu.vector_store %arg6[%c0_15, %c0_16], %30 {strides = array<i32>} : memref<8x128xf32, #tpu.memory_space<vmem>>, vector<8x128xf32>,
    return
  }
  func.func @transform_0(%arg0: i32) -> (i32, i32) {
    %c0_i32 = arith.constant 0 : i32
    %c0_i32_0 = arith.constant 0 : i32
    return %arg0, %c0_i32 : i32, i32
  }
  func.func @transform_1(%arg0: i32) -> (i32, i32) {
    %c0_i32 = arith.constant 0 : i32
    %c0_i32_0 = arith.constant 0 : i32
    %c0_i32_1 = arith.constant 0 : i32
    return %c0_i32, %c0_i32_0 : i32, i32
  }
  func.func @transform_2(%arg0: i32) -> (i32, i32) {
    %c0_i32 = arith.constant 0 : i32
    %c0_i32_0 = arith.constant 0 : i32
    %c0_i32_1 = arith.constant 0 : i32
    return %c0_i32, %c0_i32_0 : i32, i32
  }
  func.func @transform_3(%arg0: i32) -> (i32, i32) {
    %c0_i32 = arith.constant 0 : i32
    %c0_i32_0 = arith.constant 0 : i32
    %c0_i32_1 = arith.constant 0 : i32
    return %c0_i32, %c0_i32_0 : i32, i32
  }
  func.func @transform_4(%arg0: i32) -> (i32, i32) {
    %c0_i32 = arith.constant 0 : i32
    %c0_i32_0 = arith.constant 0 : i32
    %c0_i32_1 = arith.constant 0 : i32
    return %c0_i32, %c0_i32_0 : i32, i32
  }
  func.func @transform_5(%arg0: i32) -> (i32, i32) {
    %c0_i32 = arith.constant 0 : i32
    %c0_i32_0 = arith.constant 0 : i32
    return %arg0, %c0_i32 : i32, i32
  }
}

</mosaic_0001>

<bundles_post_ra>
// kernel: tpu_custom_call.1
= control target key start
LH: loop header
LB: loop body
LE: loop exit
PB: predicated region body
PF: predicated region fallthrough
CT: control target
= control target key end

     0   :  { %10 = vsyncpa [#allocation3], 0  ;;  %s823_s0 = inlined_call_operand.hbm [shape: bf16[8,256], index: 0, kind: input, shape index: {}]   ;;  %s824_s1 = inlined_call_operand.hbm [shape: bf16[256,256], index: 1, kind: input, shape index: {}]   ;;  %s825_s2 = inlined_call_operand.vmem [shape: f32[1,256], index: 2, kind: input, shape index: {}]   ;;  %s826_s3 = inlined_call_operand.hbm [shape: bf16[256,128], index: 3, kind: input, shape index: {}]   ;;  %s827_s4 = inlined_call_operand.vmem [shape: f32[1,128], index: 4, kind: input, shape index: {}]   ;;  %s828_s5 = inlined_call_operand.hbm [shape: f32[8,128], index: 5, kind: output, shape index: {}]  }
   0x1   :  { %11 = vsyncpa [#allocation6], 0 }
   0x2   :  { %12 = vsyncpa [#allocation4], 0  ;;  %s761_s18 = smov [#allocation5]  }
   0x3   :  { %s28_s19 = sshll.u32 %s761_s18, 4  ;;  %s29_s19 = int_to_ptr.vmem [resolvable:$true] %s28_s19 }
   0x4   :  { %s683_s20 = scalar_lea.vmem %s29_s19, 4096  ;;  %p688_p1 = scmp.lt.s32.totalorder %s29_s19, %s29_s19 }
   0x5   :  { %p684_p0 = scmp.ne.s32.totalorder %s29_s19, %s683_s20  ;;  %p689_p2 = scmp.lt.s32.totalorder %s683_s20, %s683_s20 }
   0x7   :  { %p690_p3 = por %p689_p2, %p688_p1 }
   0x9   :  { %p691_p4 = pnand %p690_p3, %p684_p0 }
   0xb   :  { %694 = shalt.err (!%p691_p4)
}
   0xc   :  { %s762_s21 = smov 128   ;;  %s763_s22 = smov 8  }
   0xd   :  { %34 = dma.hbm_to_vmem [thread:$0]  %s824_s1, 4096, %s29_s19, [#allocation6], %s762_s21, %s762_s21, %s763_s22  }
   0xe   :  { %s764_s25 = smov [#allocation2]   ;;  %s765_s27 = smov [#allocation7]  }
   0xf   :  { %s19_s26 = sshll.u32 %s764_s25, 4  ;;  %s42_s28 = sshll.u32 %s765_s27, 4  ;;  %s20_s26 = int_to_ptr.vmem [resolvable:$true] %s19_s26  ;;  %s43_s28 = int_to_ptr.vmem [resolvable:$true] %s42_s28 }
  0x10   :  { %s703_s29 = scalar_lea.vmem %s20_s26, 128  ;;  %p708_p6 = scmp.lt.s32.totalorder %s20_s26, %s20_s26 }
  0x11   :  { %p704_p5 = scmp.ne.s32.totalorder %s20_s26, %s703_s29  ;;  %p709_p7 = scmp.lt.s32.totalorder %s703_s29, %s703_s29 }
  0x13   :  { %p710_p8 = por %p709_p7, %p708_p6 }
  0x15   :  { %p711_p9 = pnand %p710_p8, %p704_p5 }
  0x17   :  { %714 = shalt.err (!%p711_p9)
}
  0x18   :  { %22 = dma.hbm_to_vmem [thread:$0]  %s823_s0, 128, %s20_s26, [#allocation3]  }
  0x19   :  { %s723_s7 = scalar_lea.vmem %s43_s28, 2048  ;;  %p728_p11 = scmp.lt.s32.totalorder %s43_s28, %s43_s28 }
  0x1a   :  { %p724_p10 = scmp.ne.s32.totalorder %s43_s28, %s723_s7  ;;  %p729_p12 = scmp.lt.s32.totalorder %s723_s7, %s723_s7 }
  0x1c   :  { %p730_p13 = por %p729_p12, %p728_p11 }
  0x1e   :  { %p731_p0 = pnand %p730_p13, %p724_p10 }
  0x20   :  { %734 = shalt.err (!%p731_p0)
}
  0x21   :  { %s766_s1 = smov 64   ;;  %s767_s8 = smov 4  }
  0x22   :  { %48 = dma.hbm_to_vmem [thread:$0]  %s826_s3, 2048, %s43_s28, [#allocation6], %s766_s1, %s766_s1, %s767_s8  }
  0x23   :  { %755 = dma.done.wait [#allocation3], 128  }
  0x24   :  { %756 = vsyncadd [#allocation3], 4294967168 }
  0x25   :  { %757 = dma.done.wait [#allocation6], 6144  }
  0x26   :  { %758 = vsyncadd [#allocation6], 4294961152  ;;  %v605_v0 = vld [vmem:[#allocation5 + $0x74] ss:$8 sps:$4 sm:$0xff]   ;;  %v607_v1 = vld [vmem:[#allocation5 + $0x70] ss:$8 sps:$4 sm:$0xff]   ;;  %v96_v51 = vlaneseq }
  0x27   :  { %273 = vmatprep.subr.bf16.mxu0 %v605_v0  ;;  %v608_v2 = vld [vmem:[#allocation5 + $0x64] ss:$8 sps:$4 sm:$0xff]   ;;  %v610_v3 = vld [vmem:[#allocation5 + $0x60] ss:$8 sps:$4 sm:$0xff]   ;;  %v611_v4 = vld [vmem:[#allocation5 + $0x54] ss:$8 sps:$4 sm:$0xff]  }
  0x28   :  { %274 = vmatpush1.bf16.msra.mxu0 %v607_v1  ;;  %v613_v5 = vld [vmem:[#allocation5 + $0x50] ss:$8 sps:$4 sm:$0xff]   ;;  %v614_v6 = vld [vmem:[#allocation5 + $0x44] ss:$8 sps:$4 sm:$0xff]   ;;  %v616_v7 = vld [vmem:[#allocation5 + $0x40] ss:$8 sps:$4 sm:$0xff]  }
  0x29   :  { %275 = vmatprep.subr.bf16.mxu0 %v608_v2  ;;  %v617_v8 = vld [vmem:[#allocation5 + $0x34] ss:$8 sps:$4 sm:$0xff]   ;;  %v619_v9 = vld [vmem:[#allocation5 + $0x30] ss:$8 sps:$4 sm:$0xff]   ;;  %v620_v10 = vld [vmem:[#allocation5 + $0x24] ss:$8 sps:$4 sm:$0xff]  }
  0x2a   :  { %v622_v11 = vld [vmem:[#allocation5 + $0x20] ss:$8 sps:$4 sm:$0xff]   ;;  %v623_v12 = vld [vmem:[#allocation5 + $0x14] ss:$8 sps:$4 sm:$0xff]   ;;  %v625_v13 = vld [vmem:[#allocation5 + $0x10] ss:$8 sps:$4 sm:$0xff]  }
  0x2b   :  { %v808_v14 = vld [vmem:[#allocation2] sm:$0xff]  ;;  %v626_v15 = vld [vmem:[#allocation5 + $0x4] ss:$8 sps:$4 sm:$0xff]   ;;  %v657_v19 = vld [vmem:[#allocation7 + $0x70] sm:$0xff]   ;;  %v97_v52 = vshrl.u32 %v96_v51, 7 }
  0x2c   :  { %276 = vmatpush1.bf16.msra.mxu0 %v610_v3  ;;  %v525_v16 = vcombine.high %v808_v14, %v808_v14  ;;  %v655_v17 = vld [vmem:[#allocation7 + $0x78] sm:$0xff]   ;;  %v628_v20 = vld [vmem:[#allocation5] ss:$8 sps:$4 sm:$0xff]   ;;  %v658_v21 = vld [vmem:[#allocation7 + $0x30] sm:$0xff]   ;;  %v524_v46 = vcombine.low %v808_v14, %v808_v14 }
  0x2d   :  { %277 = vmatprep.subr.bf16.mxu0 %v611_v4  ;;  %v656_v18 = vld [vmem:[#allocation7 + $0x38] sm:$0xff]   ;;  %575 = vmatprep.subr.bf16.mxu1 %v655_v17  ;;  %v659_v22 = vld [vmem:[#allocation7 + $0x68] sm:$0xff]   ;;  %v661_v26 = vld [vmem:[#allocation7 + $0x60] sm:$0xff]   ;;  %v98_v53 = vsub.s32 0, %v97_v52  ;;  %v102_v55 = vsub.s32 1, %v97_v52 }
  0x2e   :  { %305 = vmatprep.mubr.bf16.mxu0 %v525_v16  ;;  %576 = vmatpush3.bf16.msra.mxu1 %v656_v18  ;;  %v629_v23 = vld [vmem:[#allocation5 + $0xf4] ss:$8 sps:$4 sm:$0xff]   ;;  %v631_v24 = vld [vmem:[#allocation5 + $0xf0] ss:$8 sps:$4 sm:$0xff]   ;;  %v660_v25 = vld [vmem:[#allocation7 + $0x28] sm:$0xff]  }
  0x2f   :  { %577 = vmatprep.subr.bf16.mxu1 %v657_v19  ;;  %v632_v27 = vld [vmem:[#allocation5 + $0xe4] ss:$8 sps:$4 sm:$0xff]   ;;  %v634_v28 = vld [vmem:[#allocation5 + $0xe0] ss:$8 sps:$4 sm:$0xff]   ;;  %v663_v30 = vld [vmem:[#allocation7 + $0x58] sm:$0xff]  }
  0x30   :  { %278 = vmatpush1.bf16.msra.mxu0 %v613_v5  ;;  %v662_v29 = vld [vmem:[#allocation7 + $0x20] sm:$0xff]   ;;  %v635_v31 = vld [vmem:[#allocation5 + $0xd4] ss:$8 sps:$4 sm:$0xff]   ;;  %v637_v33 = vld [vmem:[#allocation5 + $0xd0] ss:$8 sps:$4 sm:$0xff]  }
  0x31   :  { %279 = vmatprep.subr.bf16.mxu0 %v614_v6  ;;  %v664_v32 = vld [vmem:[#allocation7 + $0x18] sm:$0xff]   ;;  %v665_v34 = vld [vmem:[#allocation7 + $0x50] sm:$0xff]   ;;  %v638_v35 = vld [vmem:[#allocation5 + $0xc4] ss:$8 sps:$4 sm:$0xff]  }
  0x32   :  { %578 = vmatpush3.bf16.msra.mxu1 %v658_v21  ;;  %v666_v36 = vld [vmem:[#allocation7 + $0x10] sm:$0xff]   ;;  %v640_v37 = vld [vmem:[#allocation5 + $0xc0] ss:$8 sps:$4 sm:$0xff]   ;;  %v644_v40 = vld [vmem:[#allocation5 + $0xa4] ss:$8 sps:$4 sm:$0xff]  }
  0x33   :  { %579 = vmatprep.subr.bf16.mxu1 %v659_v22  ;;  %v641_v38 = vld [vmem:[#allocation5 + $0xb4] ss:$8 sps:$4 sm:$0xff]   ;;  %v643_v39 = vld [vmem:[#allocation5 + $0xb0] ss:$8 sps:$4 sm:$0xff]   ;;  %v646_v41 = vld [vmem:[#allocation5 + $0xa0] ss:$8 sps:$4 sm:$0xff]  }
  0x34   :  { %280 = vmatpush1.bf16.msra.mxu0 %v616_v7  ;;  %v647_v42 = vld [vmem:[#allocation5 + $0x94] ss:$8 sps:$4 sm:$0xff]   ;;  %v649_v43 = vld [vmem:[#allocation5 + $0x90] ss:$8 sps:$4 sm:$0xff]   ;;  %v650_v44 = vld [vmem:[#allocation5 + $0x84] ss:$8 sps:$4 sm:$0xff]  }
  0x35   :  { %281 = vmatprep.subr.bf16.mxu0 %v617_v8  ;;  %v652_v45 = vld [vmem:[#allocation5 + $0x80] ss:$8 sps:$4 sm:$0xff]   ;;  %v94_v54 = vld [vmem:[%s825_s2] sm:$0x3]  ;;  %v495_v7 = vand.u32 127, %v96_v51  ;;  %s768_s2 = smov [#allocation8]  }
  0x36   :  { %580 = vmatpush3.bf16.msra.mxu1 %v660_v25  ;;  %v667_v47 = vld [vmem:[#allocation7 + $0x48] sm:$0xff]   ;;  %v669_v49 = vld [vmem:[#allocation7 + $0x40] sm:$0xff]   ;;  %v99_v56 = vrot.slane %v94_v54, %v98_v53  ;;  %v103_v57 = vrot.slane %v94_v54, %v102_v55  ;;  %v558_v5 = vld [vmem:[%s827_s4] ss:$0 sm:$0xff]  ;;  %s514_s4 = sshll.u32 %s768_s2, 4  ;;  %s515_s4 = int_to_ptr.vmem [resolvable:$true] %s514_s4 }
  0x37   :  { %581 = vmatprep.subr.bf16.mxu1 %v661_v26  ;;  %v668_v48 = vld [vmem:[#allocation7 + $0x8] sm:$0xff]   ;;  %v670_v50 = vld [vmem:[#allocation7] sm:$0xff]   ;;  %vm496_vm0 = vcmp.lt.s32.totalorder %v495_v7, 10  ;;  %s735_s13 = scalar_lea.vmem %s515_s4, 128  ;;  %p740_p2 = scmp.lt.s32.totalorder %s515_s4, %s515_s4 }
  0x38   :  { %282 = vmatpush1.bf16.msra.mxu0 %v619_v9  ;;  %p736_p1 = scmp.ne.s32.totalorder %s515_s4, %s735_s13  ;;  %p741_p3 = scmp.lt.s32.totalorder %s735_s13, %s735_s13 }
  0x39   :  { %283 = vmatprep.subr.bf16.mxu0 %v620_v10 }
  0x3a   :  { %582 = vmatpush3.bf16.msra.mxu1 %v662_v29  ;;  %p742_p4 = por %p741_p3, %p740_p2 }
  0x3b   :  { %583 = vmatprep.subr.bf16.mxu1 %v663_v30 }
  0x3c   :  { %284 = vmatpush1.bf16.msra.mxu0 %v622_v11  ;;  %p743_p5 = pnand %p742_p4, %p736_p1 }
  0x3d   :  { %285 = vmatprep.subr.bf16.mxu0 %v623_v12 }
  0x3e   :  { %584 = vmatpush3.bf16.msra.mxu1 %v664_v32 }
  0x3f   :  { %585 = vmatprep.subr.bf16.mxu1 %v665_v34 }
  0x40   :  { %286 = vmatpush1.bf16.msra.mxu0 %v625_v13 }
  0x41   :  { %287 = vmatprep.subr.bf16.mxu0 %v626_v15 }
  0x42   :  { %586 = vmatpush3.bf16.msra.mxu1 %v666_v36 }
  0x43   :  { %587 = vmatprep.subr.bf16.mxu1 %v667_v47 }
  0x44   :  { %288 = vmatpush1.bf16.msra.mxu0 %v628_v20 }
  0x45   :  { %289 = vmatprep.subr.bf16.mxu0 %v629_v23 }
  0x46   :  { %588 = vmatpush3.bf16.msra.mxu1 %v668_v48 }
  0x47   :  { %589 = vmatprep.subr.bf16.mxu1 %v669_v49 }
  0x48   :  { %290 = vmatpush2.bf16.msra.mxu0 %v631_v24 }
  0x49   :  { %291 = vmatprep.subr.bf16.mxu0 %v632_v27 }
  0x4a   :  { %590 = vmatpush3.bf16.msra.mxu1 %v670_v50 }
  0x4c   :  { %292 = vmatpush2.bf16.msra.mxu0 %v634_v28 }
  0x4d   :  { %293 = vmatprep.subr.bf16.mxu0 %v635_v31 }
  0x50   :  { %294 = vmatpush2.bf16.msra.mxu0 %v637_v33 }
  0x51   :  { %295 = vmatprep.subr.bf16.mxu0 %v638_v35 }
  0x54   :  { %296 = vmatpush2.bf16.msra.mxu0 %v640_v37 }
  0x55   :  { %297 = vmatprep.subr.bf16.mxu0 %v641_v38 }
  0x58   :  { %298 = vmatpush2.bf16.msra.mxu0 %v643_v39 }
  0x59   :  { %299 = vmatprep.subr.bf16.mxu0 %v644_v40 }
  0x5c   :  { %300 = vmatpush2.bf16.msra.mxu0 %v646_v41 }
  0x5d   :  { %301 = vmatprep.subr.bf16.mxu0 %v647_v42 }
  0x60   :  { %302 = vmatpush2.bf16.msra.mxu0 %v649_v43 }
  0x61   :  { %303 = vmatprep.subr.bf16.mxu0 %v650_v44 }
  0x64   :  { %304 = vmatpush2.bf16.msra.mxu0 %v652_v45 }
  0x67   :  { %306 = vmatmul.mubr.bf16.vlgmr.msra.gmra.mxu0 %v524_v46 }
 0x127   :  { %v307_v58 = vpop.f32.mrf.mxu0 }
 0x128   :  { %v308_v59 = vadd.f32 %v307_v58, %v99_v56 }
 0x129   :  { %v309_v60 = vpop.f32.mrf.mxu0 }
 0x12a   :  { %v310_v61 = vadd.f32 %v309_v60, %v103_v57  ;;  %v314_v62 = vmax.f32 %v308_v59, 0.0 }
 0x12b   :  { %v311_v63 = vpop.f32.mrf.mxu0 }
 0x12c   :  { %v315_v0 = vmax.f32 %v310_v61, 0.0  ;;  %v316_v3 = vpack.c.bf16 %v314_v62, %v314_v62 }
 0x12d   :  { %v312_v1 = vpop.f32.mrf.mxu0 }
 0x12e   :  { %v317_v2 = vpack.c.bf16 %v315_v0, %v315_v0 }
 0x130   :  { %485 = vmatprep.mubr.bf16.mxu1 %v317_v2 }
 0x131   :  { %486 = vmatmul.mubr.bf16.vlgmr.msra.gmra.mxu1 %v316_v3 }
 0x1f1   :  { %v591_v4 = vpop.f32.mrf.mxu1 }
 0x1f3   :  { %v592_v6 = vpop.f32.mrf.mxu1 }
 0x1f4   :  { %v593_v8 = vadd.f32 %v592_v6, %v591_v4 }
 0x1f5   :  { %v594_v9 = vpop.f32.mrf.mxu1 }
 0x1f6   :  { %v488_v10 = vadd.f32 %v593_v8, %v558_v5 }
 0x1f7   :  { %v595_v11 = vpop.f32.mrf.mxu1 }
 0x1f8   :  { %v493_v12 = vmax.f32 %v488_v10, 0.0 }
 0x1fa   :  { %v497_v13 = vsel %vm496_vm0, %v493_v12, -1e+30 }
 0x1fb   :  { %498 = vmax.xlane.f32.xlu0 %v497_v13 }
 0x284   :  { %v499_v14 = vpop.xlane.xlu0 %498 }
 0x285   :  { %v500_v15 = vsub.f32 %v497_v13, %v499_v14 }
 0x287   :  { %v501_v16 = vmul.f32 1.442695, %v500_v15 }
 0x289   :  { %671 = vpow2.f32 %v501_v16 }
 0x296   :  { %v672_v17 = vpop.eup %671 }
 0x297   :  { %503 = vadd.xlane.f32.xlu0 %v672_v17 }
 0x320   :  { %v504_v18 = vpop.xlane.xlu0 %503 }
 0x321   :  { %673 = vrcp.f32 %v504_v18 }
 0x32e   :  { %v674_v19 = vpop.eup %673 }
 0x32f   :  { %v506_v20 = vmul.f32 %v674_v19, %v672_v17 }
 0x331   :  { %507 = vst [vmem:[#allocation8] sm:$0xff] %v506_v20 }
 0x332   :  { %746 = shalt.err (!%p743_p5)
}
 0x333   :  { %517 = dma.vmem_to_hbm [thread:$0]  %s515_s4, 128, %s828_s5, [#allocation4]  }
 0x334   :  { %759 = dma.done.wait [#allocation4], 128  }
 0x335   :  { %760 = vsyncadd [#allocation4], 4294967168 }
 0x336   :  { %521 = vsyncpa [#allocation3], 1 }
 0x337   :  { %522 = vsyncpa [#allocation6], 1 }
 0x338   :  { %523 = vsyncpa [#allocation4], 1 }

</bundles_post_ra>
